<compile_context>
chip_gen: v5e
topology: v5e:2x2
jax: 0.10.0
libtpu: 0.0.40
codegen_flags: <defaults>
</compile_context>

<pallas_src>
import jax
import jax.numpy as jnp
from jax.experimental import pallas as pl
from jax.experimental.pallas import tpu as pltpu

EPS = 1e-5


# ---------------------------------------------------------------------------
# Hardware-aware sizing helpers
# ---------------------------------------------------------------------------
def _vmem_capacity_bytes():
    try:
        info = pltpu.get_tpu_info()
        cap = getattr(info, "vmem_capacity_bytes", None)
        if cap:
            return int(cap)
    except Exception:
        pass
    # Conservative fallback (v7x-sized VMEM) if the query is unavailable.
    return 64 * 1024 * 1024


def _main_tile_bytes(n, tc, in_bytes, out_bytes):
    # Double-buffered HBM tiles (x in + out) + in-kernel f32 working copies
    # (f32 view of x plus the centered intermediate) + gamma/beta rows
    # (padded to 8 sublanes, double-buffered).
    hbm = 2 * n * tc * (in_bytes + out_bytes)
    work = 2 * n * tc * 4
    params = 2 * 2 * 8 * tc * 4
    return hbm + work + params


def _pick_feature_tile(n, c, in_bytes, out_bytes, budget, min_step_bytes):
    """Pick the feature (lane) tile for the single-pass kernel.

    Returns None when even the smallest lane-dense column tile does not fit
    the VMEM budget -> caller falls back to the streamed two-pass kernel.
    """
    if c % 128 != 0:
        # Irregular feature dim: the lane dim must equal the full array dim.
        return c if _main_tile_bytes(n, c, in_bytes, out_bytes) <= budget else None

    cands = [c]
    t = 8192
    while t >= 128:
        if t < c and c % t == 0:
            cands.append(t)
        t //= 2

    fitting = [t for t in cands if _main_tile_bytes(n, t, in_bytes, out_bytes) <= budget]
    if not fitting:
        return None

    def steps(t):
        return pl.cdiv(c, t)

    def step_bytes(t):
        return n * t * (in_bytes + out_bytes)

    # Preference tiers: enough grid steps for pipelining / megacore, and a
    # per-step HBM byte floor so the ~0.35 us per-step overhead stays <10%.
    for min_steps, need_floor in ((4, True), (2, True), (4, False), (2, False)):
        ok = [t for t in fitting
              if steps(t) >= min_steps
              and (not need_floor or step_bytes(t) >= min_step_bytes)]
        if ok:
            return max(ok)
    return max(fitting)


def _streamed_tile_bytes(tn, tc, in_bytes, out_bytes):
    return 2 * tn * tc * (in_bytes + out_bytes) + 2 * tn * tc * 4 + 4 * 8 * tc * 4


def _pick_streamed_tiles(n, c, in_bytes, out_bytes, budget):
    # Feature tile: lane-dense, modest width so the batch tile can be large.
    if c % 128 != 0:
        tc = c
    else:
        tc = 128
        for t in (512, 256, 128):
            if c % t == 0:
                tc = t
                break
    # Batch tile: largest power-of-two multiple of 8 (or full N) in budget.
    if n <= 8:
        return n, tc
    tn = 8
    while tn * 2 <= n and _streamed_tile_bytes(tn * 2, tc, in_bytes, out_bytes) <= budget:
        tn *= 2
    return tn, tc


# ---------------------------------------------------------------------------
# Kernels
# ---------------------------------------------------------------------------
def _cbn_kernel(x_ref, gamma_ref, beta_ref, o_ref):
    # x_ref: (N, TC) block; gamma_ref / beta_ref: (1, TC) pre-selected rows.
    n = x_ref.shape[0]
    inv_n = 1.0 / n
    # Two-pass mean/var (numerically safe); x is re-read from VMEM each time
    # to keep the f32 live range short (vld slots are cheap).
    mean = jnp.sum(x_ref[...].astype(jnp.float32), axis=0, keepdims=True) * inv_n
    xc = x_ref[...].astype(jnp.float32) - mean
    var = jnp.sum(xc * xc, axis=0, keepdims=True) * inv_n
    # Fold affine into per-feature scale/shift: y = x*scale + shift.
    scale = jax.lax.rsqrt(var + EPS) * gamma_ref[...]
    shift = beta_ref[...] - mean * scale
    o_ref[...] = (x_ref[...].astype(jnp.float32) * scale + shift).astype(o_ref.dtype)


def _make_stats_kernel(n_total, tn):
    mask_needed = (n_total % tn) != 0

    def kernel(x_ref, sum_ref, sq_ref):
        i = pl.program_id(1)

        @pl.when(i == 0)
        def _():
            sum_ref[...] = jnp.zeros_like(sum_ref)
            sq_ref[...] = jnp.zeros_like(sq_ref)

        x = x_ref[...].astype(jnp.float32)
        if mask_needed:
            row = jax.lax.broadcasted_iota(jnp.int32, x.shape, 0)
            x = jnp.where((i * tn + row) < n_total, x, 0.0)
        sum_ref[...] += jnp.sum(x, axis=0, keepdims=True)
        sq_ref[...] += jnp.sum(x * x, axis=0, keepdims=True)

    return kernel


def _apply_kernel(x_ref, scale_ref, shift_ref, o_ref):
    o_ref[...] = (x_ref[...].astype(jnp.float32) * scale_ref[...]
                  + shift_ref[...]).astype(o_ref.dtype)


# ---------------------------------------------------------------------------
# Wrappers
# ---------------------------------------------------------------------------
def _cbn_streamed(x, gamma_row, beta_row, budget, vmem_limit):
    """Two-pass (stats + apply) variant for batches that don't fit a full
    (N, tc) column in VMEM. Reads x from HBM twice but keeps lane-dense tiles."""
    N, C = x.shape
    tn, tc = _pick_streamed_tiles(N, C, x.dtype.itemsize, x.dtype.itemsize, budget)
    n_steps = pl.cdiv(N, tn)
    c_steps = pl.cdiv(C, tc)

    sums, sqs = pl.pallas_call(
        _make_stats_kernel(N, tn),
        out_shape=(jax.ShapeDtypeStruct((1, C), jnp.float32),
                   jax.ShapeDtypeStruct((1, C), jnp.float32)),
        grid_spec=pltpu.PrefetchScalarGridSpec(
            num_scalar_prefetch=0,
            grid=(c_steps, n_steps),
            in_specs=[pl.BlockSpec((tn, tc), lambda j, i: (i, j))],
            out_specs=(pl.BlockSpec((1, tc), lambda j, i: (0, j)),
                       pl.BlockSpec((1, tc), lambda j, i: (0, j))),
        ),
        compiler_params=pltpu.CompilerParams(
            dimension_semantics=("parallel", "arbitrary"),
            vmem_limit_bytes=vmem_limit),
    )(x)

    inv_n = 1.0 / N
    mean = sums * inv_n
    # NOTE: E[x^2] - E[x]^2 can lose precision for large-mean / tiny-var data;
    # clamped at 0 to keep rsqrt well-defined.
    var = jnp.maximum(sqs * inv_n - mean * mean, 0.0)
    scale = gamma_row * jax.lax.rsqrt(var + EPS)
    shift = beta_row - mean * scale

    return pl.pallas_call(
        _apply_kernel,
        out_shape=jax.ShapeDtypeStruct((N, C), x.dtype),
        grid_spec=pltpu.PrefetchScalarGridSpec(
            num_scalar_prefetch=0,
            grid=(n_steps, c_steps),
            in_specs=[pl.BlockSpec((tn, tc), lambda i, j: (i, j)),
                      pl.BlockSpec((1, tc), lambda i, j: (0, j)),
                      pl.BlockSpec((1, tc), lambda i, j: (0, j))],
            out_specs=pl.BlockSpec((tn, tc), lambda i, j: (i, j)),
        ),
        compiler_params=pltpu.CompilerParams(
            dimension_semantics=("parallel", "parallel"),
            vmem_limit_bytes=vmem_limit),
    )(x, scale, shift)


def conditional_batchnorm(x, category_idx, gammas, betas, force_streamed=False):
    """x: (N, C) float; category_idx: int scalar; gammas/betas: (K, C) float."""
    N, C = x.shape

    cap = _vmem_capacity_bytes()
    budget = int(0.375 * cap)          # double-buffered tiles + f32 working set
    vmem_limit = int(0.7 * cap)        # scoped VMEM limit handed to Mosaic
    min_step_bytes = (10 << 20) if cap <= (64 << 20) else (5 << 20)

    # Select the category's affine row in the wrapper (tiny gather); the
    # kernel only sees the already-selected (1, C) rows.
    cat = jnp.asarray(category_idx, dtype=jnp.int32)
    gamma_row = jax.lax.dynamic_index_in_dim(
        gammas, cat, axis=0, keepdims=True).astype(jnp.float32)
    beta_row = jax.lax.dynamic_index_in_dim(
        betas, cat, axis=0, keepdims=True).astype(jnp.float32)

    itemsize = x.dtype.itemsize
    tc = None if force_streamed else _pick_feature_tile(
        N, C, itemsize, itemsize, budget, min_step_bytes)
    if tc is None:
        return _cbn_streamed(x, gamma_row, beta_row, budget, vmem_limit)

    grid = (pl.cdiv(C, tc),)
    return pl.pallas_call(
        _cbn_kernel,
        out_shape=jax.ShapeDtypeStruct((N, C), x.dtype),
        grid_spec=pltpu.PrefetchScalarGridSpec(
            num_scalar_prefetch=0,
            grid=grid,
            in_specs=[pl.BlockSpec((N, tc), lambda j: (0, j)),
                      pl.BlockSpec((1, tc), lambda j: (0, j)),
                      pl.BlockSpec((1, tc), lambda j: (0, j))],
            out_specs=pl.BlockSpec((N, tc), lambda j: (0, j)),
        ),
        compiler_params=pltpu.CompilerParams(
            # Feature tiles are independent -> megacore-shardable on v7x.
            dimension_semantics=("parallel",),
            vmem_limit_bytes=vmem_limit),
    )(x, gamma_row, beta_row)


def _reference(x, category_idx, gammas, betas):
    x32 = x.astype(jnp.float32)
    mean = jnp.mean(x32, axis=0, keepdims=True)
    var = jnp.mean((x32 - mean) ** 2, axis=0, keepdims=True)
    g = gammas[category_idx][None, :]
    b = betas[category_idx][None, :]
    return ((x32 - mean) / jnp.sqrt(var + EPS) * g + b).astype(x.dtype)


if __name__ == "__main__":
    num_categories = 4
    num_features = 256   # lane-dense feature dim (multiple of 128)
    batch = 8

    key = jax.random.PRNGKey(0)
    kx, kg, kb = jax.random.split(key, 3)

    x = jax.random.normal(kx, (batch, num_features), dtype=jnp.float32)
    gammas = 1.0 + 0.1 * jax.random.normal(
        kg, (num_categories, num_features), dtype=jnp.float32)
    betas = 0.1 * jax.random.normal(
        kb, (num_categories, num_features), dtype=jnp.float32)
    category_idx = jnp.int32(2)

    ref = _reference(x, 2, gammas, betas)

    # Main single-pass path.
    out = jax.block_until_ready(
        conditional_batchnorm(x, category_idx, gammas, betas))
    assert out.shape == (batch, num_features)
    assert jnp.max(jnp.abs(out - ref)) < 1e-4, "Pallas output mismatch (main path)"

    # Also exercise the streamed two-pass (large-N) path at this small shape.
    out_s = jax.block_until_ready(
        conditional_batchnorm(x, category_idx, gammas, betas, force_streamed=True))
    assert jnp.max(jnp.abs(out_s - ref)) < 1e-4, "Pallas output mismatch (streamed path)"

    print("KERNEL_OK")
</pallas_src>

<mosaic_0001>
module attributes {stable_mosaic.version = 11 : i64} {
  func.func @_cbn_kernel(%arg0: i32, %arg1: memref<8x128xf32, #tpu.memory_space<vmem>>, %arg2: memref<1x128xf32, #tpu.memory_space<vmem>>, %arg3: memref<1x128xf32, #tpu.memory_space<vmem>>, %arg4: memref<8x128xf32, #tpu.memory_space<vmem>>) attributes {dimension_semantics = [#tpu.dimension_semantics<parallel>], iteration_bounds = array<i64: 2>, scalar_prefetch = 0 : i64, scratch_operands = 0 : i64, tpu.core_type = #tpu.core_type<tc>, window_params = [{transform_indices = @transform_0, window_bounds = array<i64: 8, 128>}, {transform_indices = @transform_1, window_bounds = array<i64: 1, 128>}, {transform_indices = @transform_2, window_bounds = array<i64: 1, 128>}, {transform_indices = @transform_3, window_bounds = array<i64: 8, 128>}]} {
    %c0 = arith.constant 0 : index
    %c0_0 = arith.constant 0 : index
    %0 = vector.load %arg1[%c0, %c0_0] : memref<8x128xf32, #tpu.memory_space<vmem>>, vector<8x128xf32>
    %cst = arith.constant dense<0.000000e+00> : vector<128xf32>
    %1 = vector.multi_reduction <add>, %0, %cst [0] : vector<8x128xf32> to vector<128xf32>
    %2 = vector.shape_cast %1 : vector<128xf32> to vector<1x128xf32>
    %cst_1 = arith.constant 1.250000e-01 : f32
    %3 = vector.broadcast %cst_1 : f32 to vector<1x128xf32>
    %4 = arith.mulf %2, %3 : vector<1x128xf32>
    %c0_2 = arith.constant 0 : index
    %c0_3 = arith.constant 0 : index
    %5 = vector.load %arg1[%c0_2, %c0_3] : memref<8x128xf32, #tpu.memory_space<vmem>>, vector<8x128xf32>
    %6 = vector.broadcast %4 : vector<1x128xf32> to vector<8x128xf32>
    %7 = arith.subf %5, %6 : vector<8x128xf32>
    %8 = arith.mulf %7, %7 : vector<8x128xf32>
    %cst_4 = arith.constant dense<0.000000e+00> : vector<128xf32>
    %9 = vector.multi_reduction <add>, %8, %cst_4 [0] : vector<8x128xf32> to vector<128xf32>
    %10 = vector.shape_cast %9 : vector<128xf32> to vector<1x128xf32>
    %cst_5 = arith.constant 1.250000e-01 : f32
    %11 = vector.broadcast %cst_5 : f32 to vector<1x128xf32>
    %12 = arith.mulf %10, %11 : vector<1x128xf32>
    %cst_6 = arith.constant 9.99999974E-6 : f32
    %13 = vector.broadcast %cst_6 : f32 to vector<1x128xf32>
    %14 = arith.addf %12, %13 : vector<1x128xf32>
    %15 = math.rsqrt %14 : vector<1x128xf32>
    %c0_7 = arith.constant 0 : index
    %c0_8 = arith.constant 0 : index
    %16 = vector.load %arg2[%c0_7, %c0_8] : memref<1x128xf32, #tpu.memory_space<vmem>>, vector<1x128xf32>
    %17 = arith.mulf %15, %16 : vector<1x128xf32>
    %c0_9 = arith.constant 0 : index
    %c0_10 = arith.constant 0 : index
    %18 = vector.load %arg3[%c0_9, %c0_10] : memref<1x128xf32, #tpu.memory_space<vmem>>, vector<1x128xf32>
    %19 = arith.mulf %4, %17 : vector<1x128xf32>
    %20 = arith.subf %18, %19 : vector<1x128xf32>
    %c0_11 = arith.constant 0 : index
    %c0_12 = arith.constant 0 : index
    %21 = vector.load %arg1[%c0_11, %c0_12] : memref<8x128xf32, #tpu.memory_space<vmem>>, vector<8x128xf32>
    %22 = vector.broadcast %17 : vector<1x128xf32> to vector<8x128xf32>
    %23 = arith.mulf %21, %22 : vector<8x128xf32>
    %24 = vector.broadcast %20 : vector<1x128xf32> to vector<8x128xf32>
    %25 = arith.addf %23, %24 : vector<8x128xf32>
    %c0_13 = arith.constant 0 : index
    %c0_14 = arith.constant 0 : index
    %26 = vector.load %arg4[%c0_13, %c0_14] : memref<8x128xf32, #tpu.memory_space<vmem>>, vector<8x128xf32>
    tpu.vector_store %arg4[%c0_13, %c0_14], %25 {strides = array<i32>} : memref<8x128xf32, #tpu.memory_space<vmem>>, vector<8x128xf32>,
    return
  }
  func.func @transform_0(%arg0: i32) -> (i32, i32) {
    %c0_i32 = arith.constant 0 : i32
    %c0_i32_0 = arith.constant 0 : i32
    return %c0_i32, %arg0 : i32, i32
  }
  func.func @transform_1(%arg0: i32) -> (i32, i32) {
    %c0_i32 = arith.constant 0 : i32
    %c0_i32_0 = arith.constant 0 : i32
    return %c0_i32, %arg0 : i32, i32
  }
  func.func @transform_2(%arg0: i32) -> (i32, i32) {
    %c0_i32 = arith.constant 0 : i32
    %c0_i32_0 = arith.constant 0 : i32
    return %c0_i32, %arg0 : i32, i32
  }
  func.func @transform_3(%arg0: i32) -> (i32, i32) {
    %c0_i32 = arith.constant 0 : i32
    %c0_i32_0 = arith.constant 0 : i32
    return %c0_i32, %arg0 : i32, i32
  }
}

</mosaic_0001>

<bundles_post_ra>
// kernel: tpu_custom_call.1
= control target key start
LH: loop header
LB: loop body
LE: loop exit
PB: predicated region body
PF: predicated region fallthrough
CT: control target
= control target key end

     0   :  { %s850_s0 = inlined_call_operand.hbm [shape: f32[8,256], index: 0, kind: input, shape index: {}]   ;;  %s851_s1 = inlined_call_operand.hbm [shape: f32[1,256], index: 1, kind: input, shape index: {}]   ;;  %s852_s2 = inlined_call_operand.hbm [shape: f32[1,256], index: 2, kind: input, shape index: {}]   ;;  %s853_s3 = inlined_call_operand.hbm [shape: f32[8,256], index: 3, kind: output, shape index: {}]  }
   0x1   :  { %854 = sst [smem:[#allocation12_spill]] %s851_s1 }
   0x2   :  { %8 = vsyncpa [#allocation3], 0 }
   0x3   :  { %10 = vsyncpa [#allocation3 + $0x1], 0 }
   0x4   :  { %11 = vsyncpa [#allocation6], 0 }
   0x5   :  { %13 = vsyncpa [#allocation6 + $0x1], 0 }
   0x6   :  { %14 = vsyncpa [#allocation4], 0 }
   0x7   :  { %16 = vsyncpa [#allocation4 + $0x1], 0  ;;  %s668_s12 = smov 0   ;;  %s670_s13 = smov 0  }
   0x8   :  { %s672_s14 = smov 0   ;;  %s674_s15 = smov 0  }
   0x9 LB: > { %s689_s16 = sadd.s32 4294967295, %s646_s15   ;;  %s416_s17 = sadd.s32 4294967294, %s646_s15   ;;  %s646_s15 = sphi %s674_s15, %s864_s15   ;;  %s642_s14 = sphi %s672_s14, %s863_s14   ;;  %s638_s13 = sphi %s670_s13, %s862_s13   ;;  %s634_s12 = sphi %s668_s12, %s861_s12  }
   0xa   : > { %s693_s18 = sadd.s32 1, %s646_s15   ;;  %s29_s19 = sadd.s32 1, %s642_s14 }
   0xb   : > { %s26_s20 = ssub.s32 %s646_s15, %s693_s18  ;;  %p36_p0 = scmp.ne.s32.totalorder %s642_s14, %s638_s13 }
   0xc   : > { %p27_p1 = scmp.eq.s32.totalorder %s26_s20, 0  ;;  %p37_p2 = scmp.eq.s32.totalorder %s646_s15, 0 }
   0xd   : > { %p42_p3 = scmp.ne.s32.totalorder %s638_s13, %s634_s12  ;;  %p43_p4 = scmp.eq.s32.totalorder %s689_s16, 0 }
   0xe   : > { %s705_s21 = scalar_select %p27_p1, %s642_s14, %s29_s19  }
   0xf   : > { %p38_p5 = por %p37_p2, %p36_p0  ;;  %p707_p6 = por %p43_p4, %p42_p3 }
  0x10   : > { %p118_p7 = scmp.eq.s32.totalorder %s689_s16, 1  ;;  %p124_p8 = scmp.eq.s32.totalorder %s416_s17, 1 }
  0x11   : > { %p418_p9 = scmp.ge.s32.totalorder %s646_s15, 2  ;;  %p450_p10 = scmp.lt.s32.totalorder %s646_s15, 2 }
  0x12   : > { %p714_p11 = por %p118_p7, %p36_p0  ;;  %p718_p12 = por %p124_p8, %p42_p3 }
  0x13   : > { %s723_s25 = sand.u32 1, %s642_s14   ;;  %p725_p13 = pnand %p450_p10, %p38_p5 }
  0x14   : > { %s163_s27 = sand.u32 1, %s646_s15   ;;  %s859_s1 = sld [smem:[#allocation12_spill]] }
  0x15   : > { %s166_s4 = scalar_lea.vmem [#allocation5], %s723_s25  ;;  %p421_p0 = scmp.ge.s32.totalorder %s646_s15, 1 }
  0x16   : > { %s173_s5 = sshll.u32 %s166_s4, 4  ;;  %s736_s7 = scalar_lea.sflag [#allocation6], %s163_s27  ;;  %s174_s5 = int_to_ptr.vmem [resolvable:$true] %s173_s5 }
  0x17   : > { %p490_p2 = pneg %p725_p13 }
  0x1a   : > { %s169_s30 = scalar_lea.hbm %s859_s1, %s646_s15  ;;  %s493_s17 = scalar_lea.hbm %s859_s1, 2 }
  0x1b   : > { %s171_s6 = sshll.u32 %s169_s30, 4  ;;  %s172_s6 = int_to_ptr.hbm [resolvable:$true] %s171_s6 }
  0x1c   : > { %s486_s8 = sshra.s32 %s172_s6, 4  ;;  %s487_s8 = int_to_ptr.hbm [resolvable:$true] %s486_s8 }
  0x1d   : > { %s488_s9 = scalar_lea.hbm %s487_s8, 1  ;;  %p494_p5 = scmp.lt.s32.totalorder %s487_s8, %s859_s1 }
  0x1e   : > { %p489_p1 = scmp.ne.s32.totalorder %s487_s8, %s488_s9  ;;  %p495_p7 = scmp.lt.s32.totalorder %s493_s17, %s488_s9 }
  0x20   : > { %p491_p3 = pnand %p490_p2, %p489_p1  ;;  %p496_p8 = por %p495_p7, %p494_p5 }
  0x22   : > { %p492_p4 = pneg %p491_p3 }
  0x24   : > { %p497_p10 = pnand %p496_p8, %p492_p4 }
  0x26   : > { %500 = shalt.err (!%p497_p10)
}
  0x27   : > { %442 = dma.hbm_to_vmem [thread:$0]  (!%p725_p13), %s172_s6, 16, %s174_s5, %s736_s7  }
  0x28   : > { %p195_p1 = scmp.lt.s32.totalorder %s646_s15, 3  ;;  %s419_s27 = sshll.u32 %s723_s25, 3 }
  0x29   : > { %s420_s28 = sshll.u32 %s646_s15, 3  ;;  %s148_s9 = scalar_lea.vmem [#allocation2], %s419_s27 }
  0x2a   : > { %p757_p3 = pnand %p421_p0, %p195_p1  ;;  %s152_s8 = scalar_lea.hbm %s850_s0, %s420_s28 }
  0x2b   : > { %s156_s10 = sshll.u32 %s148_s9, 4  ;;  %s154_s11 = sshll.u32 %s152_s8, 4  ;;  %s157_s10 = int_to_ptr.vmem [resolvable:$true] %s156_s10  ;;  %s155_s11 = int_to_ptr.hbm [resolvable:$true] %s154_s11 }
  0x2c   : > { %s145_s17 = scalar_lea.sflag [#allocation3], %s723_s25  ;;  %s516_s5 = sshra.s32 %s155_s11, 4  ;;  %s517_s5 = int_to_ptr.hbm [resolvable:$true] %s516_s5 }
  0x2d   : > { %s518_s6 = scalar_lea.hbm %s517_s5, 8  ;;  %s523_s1 = scalar_lea.hbm %s850_s0, 16 }
  0x2e   : > { %p519_p4 = scmp.ne.s32.totalorder %s517_s5, %s518_s6  ;;  %p524_p7 = scmp.lt.s32.totalorder %s517_s5, %s850_s0 }
  0x2f   : > { %p525_p8 = scmp.lt.s32.totalorder %s523_s1, %s518_s6 }
  0x30   : > { %p521_p0 = pnand %p519_p4, %p490_p2 }
  0x31   : > { %p526_p10 = por %p525_p8, %p524_p7 }
  0x32   : > { %p522_p5 = pneg %p521_p0 }
  0x34   : > { %p527_p1 = pnand %p526_p10, %p522_p5 }
  0x36   : > { %530 = shalt.err (!%p527_p1)
}
  0x37   : > { %439 = dma.hbm_to_vmem [thread:$0]  (!%p725_p13), %s155_s11, 128, %s157_s10, %s145_s17  }
  0x38   : > { %s186_s8 = scalar_lea.hbm %s852_s2, %s646_s15  ;;  %s183_s9 = scalar_lea.vmem [#allocation7], %s723_s25 }
  0x39   : > { %s190_s19 = sshll.u32 %s183_s9, 4  ;;  %s188_s20 = sshll.u32 %s186_s8, 4  ;;  %s191_s19 = int_to_ptr.vmem [resolvable:$true] %s190_s19  ;;  %s189_s20 = int_to_ptr.hbm [resolvable:$true] %s188_s20 }
  0x3a   : > { %s546_s5 = sshra.s32 %s189_s20, 4  ;;  %s553_s10 = scalar_lea.hbm %s852_s2, 2  ;;  %s547_s5 = int_to_ptr.hbm [resolvable:$true] %s546_s5 }
  0x3b   : > { %s548_s1 = scalar_lea.hbm %s547_s5, 1  ;;  %p554_p7 = scmp.lt.s32.totalorder %s547_s5, %s852_s2 }
  0x3c   : > { %p549_p4 = scmp.ne.s32.totalorder %s547_s5, %s548_s1  ;;  %p555_p8 = scmp.lt.s32.totalorder %s553_s10, %s548_s1 }
  0x3e   : > { %p551_p0 = pnand %p549_p4, %p490_p2  ;;  %p556_p10 = por %p555_p8, %p554_p7 }
  0x40   : > { %p552_p5 = pneg %p551_p0 }
  0x42   : > { %p557_p1 = pnand %p556_p10, %p552_p5 }
  0x44   : > { %560 = shalt.err (!%p557_p1)
}
  0x45   : > { %445 = dma.hbm_to_vmem [thread:$0]  (!%p725_p13), %s189_s20, 16, %s191_s19, %s736_s7  }
  0x46   : > { %199 = sbr.rel (%p757_p3) target bundleno = 145 (0x91), region = 32  ;;  %s796_s25 = sand.u32 (!%p757_p3), 1, %s638_s13  }
  0x47   : > { %s422_s28 = sshll.u32 (!%p757_p3), %s796_s25, 3  ;;  %s202_s27 = scalar_lea.sflag (!%p757_p3), [#allocation3], %s796_s25 }
  0x48   : > { %s205_s4 = scalar_lea.vmem (!%p757_p3), [#allocation2], %s422_s28 }
  0x4b   : > { %621 = dma.done.wait (%p707_p6), %s202_s27, 128  }
  0x4c   : > { %623 = vsyncadd (%p707_p6), %s202_s27, 4294967168  ;;  %s211_s26 = sand.u32 1, %s689_s16   ;;  %s214_s29 = scalar_lea.vmem [#allocation5], %s796_s25 }
  0x4d   : > { %s212_s7 = scalar_lea.sflag [#allocation6], %s211_s26 }
  0x4e   : > { %625 = dma.done.wait (%p707_p6), %s212_s7, 32  }
  0x4f   : > { %627 = vsyncadd (%p707_p6), %s212_s7, 4294967264  ;;  %v255_v0 = vld [vmem:[%s205_s4] sm:$0xff]  ;;  %s425_s22 = sshll.u32 %s689_s16, 3  ;;  %s223_s8 = scalar_lea.vmem [#allocation7], %s796_s25 }
  0x50   : > { %v256_v1 = vrot.slane %v255_v0, 4  ;;  %v283_v24 = vld [vmem:[%s214_s29] sm:$0x1]  ;;  %s306_s20 = scalar_lea.hbm %s853_s3, %s425_s22  ;;  %s254_s5 = scalar_lea.vmem [#allocation8], %s422_s28 }
  0x51   : > { %v285_v27 = vld [vmem:[%s223_s8] sm:$0x1]  ;;  %s308_s1 = sshll.u32 %s254_s5, 4  ;;  %s310_s6 = sshll.u32 %s306_s20, 4  ;;  %s309_s1 = int_to_ptr.vmem [resolvable:$true] %s308_s1  ;;  %s311_s6 = int_to_ptr.hbm [resolvable:$true] %s310_s6 }
  0x52   : > { %v257_v2 = vadd.f32 %v256_v1, %v255_v0  ;;  %s296_s16 = scalar_lea.sflag [#allocation4], %s796_s25  ;;  %s590_s30 = sshra.s32 %s311_s6, 4  ;;  %s591_s30 = int_to_ptr.hbm [resolvable:$true] %s590_s30 }
  0x53   : > { %s592_s10 = scalar_lea.hbm %s591_s30, 8  ;;  %s596_s27 = scalar_lea.hbm %s853_s3, 16 }
  0x54   : > { %v258_v3 = vrot.slane %v257_v2, 2  ;;  %p593_p6 = scmp.ne.s32.totalorder %s591_s30, %s592_s10  ;;  %p597_p3 = scmp.lt.s32.totalorder %s591_s30, %s853_s3 }
  0x55   : > { %p598_p4 = scmp.lt.s32.totalorder %s596_s27, %s592_s10 }
  0x56   : > { %v259_v4 = vadd.f32 %v258_v3, %v257_v2  ;;  %p594_p13 = pnand %p593_p6, %p714_p11 }
  0x57   : > { %p599_p0 = por %p598_p4, %p597_p3 }
  0x58   : > { %v260_v5 = vrot.slane %v259_v4, 1  ;;  %p595_p2 = pneg %p594_p13 }
  0x5a   : > { %v261_v6 = vadd.f32 %v260_v5, %v259_v4  ;;  %p600_p5 = pnand %p599_p0, %p595_p2 }
  0x5c   : > { %v262_v7 = vmul.f32 0.125, %v261_v6 }
  0x5e   : > { %v263_v8 = vsub.f32 %v255_v0, %v262_v7 }
  0x60   : > { %v264_v9 = vmul.f32 %v263_v8, %v263_v8 }
  0x62   : > { %v265_v10 = vrot.slane %v264_v9, 4 }
  0x64   : > { %v266_v11 = vadd.f32 %v265_v10, %v264_v9 }
  0x66   : > { %v267_v12 = vrot.slane %v266_v11, 2 }
  0x68   : > { %v268_v13 = vadd.f32 %v267_v12, %v266_v11 }
  0x6a   : > { %v269_v14 = vrot.slane %v268_v13, 1 }
  0x6c   : > { %v270_v15 = vadd.f32 %v269_v14, %v268_v13 }
  0x6e   : > { %v271_v16 = vmul.f32 0.125, %v270_v15 }
  0x70   : > { %v272_v17 = vadd.f32 1e-05, %v271_v16 }
  0x72   : > { %484 = vrsqrt.f32 %v272_v17  ;;  %vm279_vm0 = vweird.f32 %v272_v17 }
  0x78   : > { %v485_v18 = vpop.eup %484 }
  0x79   : > { %v274_v19 = vmul.f32 %v485_v18, %v272_v17  ;;  %vm280_vm1 = vweird.f32 %v485_v18 }
  0x7a   : > { %vm281_vm2 = vmor %vm279_vm0, %vm280_vm1 }
  0x7b   : > { %v275_v20 = vmul.f32 %v485_v18, %v274_v19 }
  0x7d   : > { %v276_v21 = vmul.f32 0.5, %v275_v20 }
  0x7f   : > { %v277_v22 = vsub.f32 1.5, %v276_v21 }
  0x81   : > { %v278_v23 = vmul.f32 %v485_v18, %v277_v22 }
  0x83   : > { %v282_v25 = vsel %vm281_vm2, %v485_v18, %v278_v23 }
  0x84   : > { %v284_v26 = vmul.f32 %v283_v24, %v282_v25 }
  0x86   : > { %v286_v28 = vmul.f32 %v284_v26, %v262_v7  ;;  %v288_v29 = vperm.slane %v284_v26, 0 }
  0x88   : > { %v287_v30 = vsub.f32 %v285_v27, %v286_v28  ;;  %v289_v31 = vmul.f32 %v288_v29, %v255_v0 }
  0x8a   : > { %v291_v32 = vperm.slane %v287_v30, 0 }
  0x8c   : > { %v293_v33 = vadd.f32 %v291_v32, %v289_v31 }
  0x8e   : > { %294 = vst [vmem:[%s254_s5] sm:$0xff] %v293_v33 }
  0x8f   : > { %603 = shalt.err (!%p600_p5)
}
  0x90   : > { %434 = dma.vmem_to_hbm [thread:$0]  (%p714_p11), %s309_s1, 128, %s311_s6, %s296_s16  }
  0x91 PF: > { %s322_s25 = sand.u32 1, %s634_s12   ;;  %p447_p7 = pnand %p418_p9, %p718_p12 }
  0x92   : > { %s323_s26 = scalar_lea.sflag [#allocation4], %s322_s25 }
  0x93   : > { %p448_p8 = pneg %p447_p7 }
  0x95   : > { %629 = dma.done.wait (%p448_p8), %s323_s26, 128  }
  0x96   : > { %631 = vsyncadd (%p448_p8), %s323_s26, 4294967168  ;;  %p19_p10 = scmp.ge.s32.totalorder %s693_s18, 4   ;;  %s861_s12 = smov %s638_s13 }
  0x97   : > { %s862_s13 = smov %s642_s14  ;;  %s863_s14 = smov %s705_s21 }
  0x98   : > { %s864_s15 = smov %s693_s18  ;;  %21 = sbr.rel (!%p19_p10) target bundleno = 9 (0x9), region = 101 }
  0x9d   :  { %329 = vsyncpa [#allocation3], 1 }
  0x9e   :  { %331 = vsyncpa [#allocation3 + $0x1], 1 }
  0x9f   :  { %332 = vsyncpa [#allocation6], 1 }
  0xa0   :  { %334 = vsyncpa [#allocation6 + $0x1], 1 }
  0xa1   :  { %335 = vsyncpa [#allocation4], 1 }
  0xa2   :  { %337 = vsyncpa [#allocation4 + $0x1], 1 }

</bundles_post_ra>
